<compile_context>
chip_gen: v7x
topology: tpu7x:2x2x1
jax: 0.10.0
libtpu: 0.0.40
codegen_flags: <defaults>
</compile_context>

<pallas_src>
import math

import jax
import jax.numpy as jnp
from jax.experimental import pallas as pl
from jax.experimental.pallas import tpu as pltpu

MIN_LOGSTD = math.log(0.1)
MAX_LOGSTD = math.log(0.2)


def _softplus(z):
    # Numerically-stable softplus (beta=1), matches torch.nn.Softplus.
    return jnp.maximum(z, 0.0) + jnp.log1p(jnp.exp(-jnp.abs(z)))


def _round_up(n, m):
    return ((n + m - 1) // m) * m


def mlp_kernel(xT_ref, w1t_ref, b1t_ref, w2t_ref, b2t_ref, w3_ref, b3_ref, out_ref):
    mxu_dtype = w1t_ref.dtype            # bf16 by default (v6e/v7x MXU); f32 also works
    x = xT_ref[...].astype(mxu_dtype)    # [in_dim, TB]; no-op cast if dtypes match

    # Layer 1: [hid, in_dim] @ [in_dim, TB] -> [hid, TB], f32 accumulation.
    h1 = jnp.dot(w1t_ref[...], x, preferred_element_type=jnp.float32)
    h1 = jnp.maximum(h1 + b1t_ref[...].astype(jnp.float32), 0.0)

    # Layer 2: [hid, hid] @ [hid, TB] -> [hid, TB].
    h2 = jnp.dot(w2t_ref[...], h1.astype(mxu_dtype), preferred_element_type=jnp.float32)
    h2 = jnp.maximum(h2 + b2t_ref[...].astype(jnp.float32), 0.0)

    # Head (out_dim == 2): VPU broadcast-multiply + sublane reduce instead of an
    # N=2 MXU matmul.
    w_mu = w3_ref[:, 0:1].astype(jnp.float32)    # [hid, 1]
    w_ls = w3_ref[:, 1:2].astype(jnp.float32)    # [hid, 1]
    b3 = b3_ref[...].astype(jnp.float32)         # [1, 2]
    mu = jnp.sum(h2 * w_mu, axis=0, keepdims=True) + b3[0:1, 0:1]        # [1, TB]
    logstd = jnp.sum(h2 * w_ls, axis=0, keepdims=True) + b3[0:1, 1:2]    # [1, TB]

    # Soft double-clamp of logstd, then std = exp(logstd) (matches the PyTorch module).
    logstd = MAX_LOGSTD - _softplus(MAX_LOGSTD - logstd)
    logstd = MIN_LOGSTD + _softplus(logstd - MIN_LOGSTD)
    std = jnp.exp(logstd)

    # Single lane-dense [2, TB] output block: row 0 = mu, row 1 = std.
    out_ref[0:1, :] = mu.astype(out_ref.dtype)
    out_ref[1:2, :] = std.astype(out_ref.dtype)


def simple_mlp_forward(x, params, *, block_batch=512):
    """x: [B, in_dim] float32. params: dict (see init_params). Returns (mu[B], std[B])."""
    w1t, b1t = params["w1t"], params["b1t"]
    w2t, b2t = params["w2t"], params["b2t"]
    w3, b3 = params["w3"], params["b3"]

    B, in_dim = x.shape
    hid = w1t.shape[0]
    assert w1t.shape == (hid, in_dim) and w2t.shape == (hid, hid)
    assert b1t.shape == (hid, 1) and b2t.shape == (hid, 1)
    assert w3.shape == (hid, 2) and b3.shape == (1, 2)

    # Batch tile: multiple of 128 lanes, capped by (padded) B.
    tb = min(_round_up(block_batch, 128), _round_up(B, 128))
    bp = _round_up(B, tb)
    grid = (pl.cdiv(bp, tb),)

    # Layout plumbing in the wrapper: put batch on the lane axis and pad to the tile.
    xT = jnp.pad(jnp.transpose(x), ((0, 0), (0, bp - B)))     # [in_dim, Bp]

    def resident(shape):
        n = len(shape)
        return pl.BlockSpec(shape, lambda i, _n=n: (0,) * _n)  # constant -> stays in VMEM

    out = pl.pallas_call(
        mlp_kernel,
        out_shape=jax.ShapeDtypeStruct((2, bp), jnp.float32),
        grid=grid,
        in_specs=[
            pl.BlockSpec((in_dim, tb), lambda i: (0, i)),       # x tile, pipelined
            resident((hid, in_dim)), resident((hid, 1)),        # w1t, b1t
            resident((hid, hid)), resident((hid, 1)),           # w2t, b2t
            resident((hid, 2)), resident((1, 2)),               # w3, b3
        ],
        out_specs=pl.BlockSpec((2, tb), lambda i: (0, i)),
        compiler_params=pltpu.CompilerParams(
            dimension_semantics=("parallel",)),                 # 2 TCs on v7x
    )(xT, w1t, b1t, w2t, b2t, w3, b3)

    return out[0, :B], out[1, :B]


def init_params(key, in_dim, hid_dim, out_dim=2, param_dtype=jnp.bfloat16):
    """nn.Linear-style init (uniform +/- 1/sqrt(fan_in)), stored in kernel layout.

    w1t/w2t use PyTorch nn.Linear.weight layout ([out_features, in_features]) and
    are stored in `param_dtype` (bf16 by default for the v6e/v7x MXU). Biases and
    the tiny 2-wide head stay f32 (elementwise epilogue runs in f32).
    """
    assert out_dim == 2, "SimpleMLP head is (mu, logstd)"
    ks = jax.random.split(key, 6)

    def unif(k, shape, fan_in):
        bound = 1.0 / math.sqrt(fan_in)
        return jax.random.uniform(k, shape, jnp.float32, -bound, bound)

    return {
        "w1t": unif(ks[0], (hid_dim, in_dim), in_dim).astype(param_dtype),
        "b1t": unif(ks[1], (hid_dim, 1), in_dim),
        "w2t": unif(ks[2], (hid_dim, hid_dim), hid_dim).astype(param_dtype),
        "b2t": unif(ks[3], (hid_dim, 1), hid_dim),
        "w3":  unif(ks[4], (hid_dim, out_dim), hid_dim),
        "b3":  unif(ks[5], (1, out_dim), hid_dim),
    }


def _reference_forward(x, params):
    # Pure-JAX reference using the same mixed precision as the kernel.
    hp = jax.lax.Precision.HIGHEST
    cd = params["w1t"].dtype
    w1 = params["w1t"].astype(jnp.float32)
    w2 = params["w2t"].astype(jnp.float32)
    xq = x.astype(cd).astype(jnp.float32)
    h1 = jnp.maximum(jnp.dot(xq, w1.T, precision=hp) + params["b1t"][:, 0], 0.0)
    h1q = h1.astype(cd).astype(jnp.float32)
    h2 = jnp.maximum(jnp.dot(h1q, w2.T, precision=hp) + params["b2t"][:, 0], 0.0)
    out = jnp.dot(h2, params["w3"], precision=hp) + params["b3"][0]
    mu, logstd = out[:, 0], out[:, 1]
    logstd = MAX_LOGSTD - _softplus(MAX_LOGSTD - logstd)
    logstd = MIN_LOGSTD + _softplus(logstd - MIN_LOGSTD)
    return mu, jnp.exp(logstd)


if __name__ == "__main__":
    key = jax.random.PRNGKey(0)
    # Small demo shapes; B deliberately not a multiple of the tile to exercise padding.
    B, in_dim, hid_dim = 200, 32, 128

    kx, kp = jax.random.split(key)
    x = jax.random.normal(kx, (B, in_dim), jnp.float32)
    params = init_params(kp, in_dim, hid_dim)

    mu, std = simple_mlp_forward(x, params, block_batch=128)   # grid=(2,) at B=200
    jax.block_until_ready((mu, std))

    assert mu.shape == (B,) and std.shape == (B,)
    mu_ref, std_ref = _reference_forward(x, params)
    assert bool(jnp.allclose(mu, mu_ref, atol=5e-3, rtol=5e-3))
    assert bool(jnp.allclose(std, std_ref, atol=5e-3, rtol=5e-3))
    # std is (approximately) soft-clamped to [0.1, 0.2]
    assert bool(jnp.all(std > 0.05)) and bool(jnp.all(std < 0.3))
    print("KERNEL_OK")
</pallas_src>

<mosaic_0001>
module attributes {stable_mosaic.version = 11 : i64} {
  func.func @mlp_kernel(%arg0: i32, %arg1: memref<32x128xf32, #tpu.memory_space<vmem>>, %arg2: memref<128x32xbf16, #tpu.memory_space<vmem>>, %arg3: memref<128x1xf32, #tpu.memory_space<vmem>>, %arg4: memref<128x128xbf16, #tpu.memory_space<vmem>>, %arg5: memref<128x1xf32, #tpu.memory_space<vmem>>, %arg6: memref<128x2xf32, #tpu.memory_space<vmem>>, %arg7: memref<1x2xf32, #tpu.memory_space<vmem>>, %arg8: memref<2x128xf32, #tpu.memory_space<vmem>>) attributes {dimension_semantics = [#tpu.dimension_semantics<parallel>], iteration_bounds = array<i64: 2>, scalar_prefetch = 0 : i64, scratch_operands = 0 : i64, tpu.core_type = #tpu.core_type<tc>, window_params = [{transform_indices = @transform_0, window_bounds = array<i64: 32, 128>}, {pipeline_mode = #tpu.pipeline_mode<synchronous>, transform_indices = @transform_1, window_bounds = array<i64: 128, 32>}, {pipeline_mode = #tpu.pipeline_mode<synchronous>, transform_indices = @transform_2, window_bounds = array<i64: 128, 1>}, {pipeline_mode = #tpu.pipeline_mode<synchronous>, transform_indices = @transform_3, window_bounds = array<i64: 128, 128>}, {pipeline_mode = #tpu.pipeline_mode<synchronous>, transform_indices = @transform_4, window_bounds = array<i64: 128, 1>}, {pipeline_mode = #tpu.pipeline_mode<synchronous>, transform_indices = @transform_5, window_bounds = array<i64: 128, 2>}, {pipeline_mode = #tpu.pipeline_mode<synchronous>, transform_indices = @transform_6, window_bounds = array<i64: 1, 2>}, {transform_indices = @transform_7, window_bounds = array<i64: 2, 128>}]} {
    %c0 = arith.constant 0 : index
    %c0_0 = arith.constant 0 : index
    %0 = vector.load %arg1[%c0, %c0_0] : memref<32x128xf32, #tpu.memory_space<vmem>>, vector<32x128xf32>
    %1 = arith.truncf %0 : vector<32x128xf32> to vector<32x128xbf16>
    %c0_1 = arith.constant 0 : index
    %c0_2 = arith.constant 0 : index
    %2 = vector.load %arg2[%c0_1, %c0_2] : memref<128x32xbf16, #tpu.memory_space<vmem>>, vector<128x32xbf16>
    %cst = arith.constant dense<0.000000e+00> : vector<128x128xf32>
    %3 = tpu.matmul %2, %1, %cst {dimension_numbers = #tpu.dot_dimension_numbers<[1], [0], [0], [1], [0, 0, 1, 1], [], []>} : vector<128x32xbf16>, vector<32x128xbf16>, vector<128x128xf32> -> vector<128x128xf32>
    %c0_3 = arith.constant 0 : index
    %c0_4 = arith.constant 0 : index
    %4 = vector.load %arg3[%c0_3, %c0_4] : memref<128x1xf32, #tpu.memory_space<vmem>>, vector<128x1xf32>
    %5 = vector.broadcast %4 : vector<128x1xf32> to vector<128x128xf32>
    %6 = arith.addf %3, %5 : vector<128x128xf32>
    %cst_5 = arith.constant 0.000000e+00 : f32
    %7 = vector.broadcast %cst_5 : f32 to vector<128x128xf32>
    %8 = arith.maximumf %6, %7 : vector<128x128xf32>
    %c0_6 = arith.constant 0 : index
    %c0_7 = arith.constant 0 : index
    %9 = vector.load %arg4[%c0_6, %c0_7] : memref<128x128xbf16, #tpu.memory_space<vmem>>, vector<128x128xbf16>
    %10 = arith.truncf %8 : vector<128x128xf32> to vector<128x128xbf16>
    %cst_8 = arith.constant dense<0.000000e+00> : vector<128x128xf32>
    %11 = tpu.matmul %9, %10, %cst_8 {dimension_numbers = #tpu.dot_dimension_numbers<[1], [0], [0], [1], [0, 0, 1, 1], [], []>} : vector<128x128xbf16>, vector<128x128xbf16>, vector<128x128xf32> -> vector<128x128xf32>
    %c0_9 = arith.constant 0 : index
    %c0_10 = arith.constant 0 : index
    %12 = vector.load %arg5[%c0_9, %c0_10] : memref<128x1xf32, #tpu.memory_space<vmem>>, vector<128x1xf32>
    %13 = vector.broadcast %12 : vector<128x1xf32> to vector<128x128xf32>
    %14 = arith.addf %11, %13 : vector<128x128xf32>
    %cst_11 = arith.constant 0.000000e+00 : f32
    %15 = vector.broadcast %cst_11 : f32 to vector<128x128xf32>
    %16 = arith.maximumf %14, %15 : vector<128x128xf32>
    %c0_12 = arith.constant 0 : index
    %c0_13 = arith.constant 0 : index
    %17 = vector.load %arg6[%c0_12, %c0_13] : memref<128x2xf32, #tpu.memory_space<vmem>>, vector<128x1xf32>
    %c0_14 = arith.constant 0 : index
    %c1 = arith.constant 1 : index
    %18 = vector.load %arg6[%c0_14, %c1] : memref<128x2xf32, #tpu.memory_space<vmem>>, vector<128x1xf32>
    %c0_15 = arith.constant 0 : index
    %c0_16 = arith.constant 0 : index
    %19 = vector.load %arg7[%c0_15, %c0_16] : memref<1x2xf32, #tpu.memory_space<vmem>>, vector<1x2xf32>
    %20 = vector.broadcast %17 : vector<128x1xf32> to vector<128x128xf32>
    %21 = arith.mulf %16, %20 : vector<128x128xf32>
    %cst_17 = arith.constant dense<0.000000e+00> : vector<128xf32>
    %22 = vector.multi_reduction <add>, %21, %cst_17 [0] : vector<128x128xf32> to vector<128xf32>
    %23 = vector.shape_cast %22 : vector<128xf32> to vector<1x128xf32>
    %24 = vector.extract_strided_slice %19 {offsets = [0, 0], sizes = [1, 1], strides = [1, 1]} : vector<1x2xf32> to vector<1x1xf32>
    %25 = vector.broadcast %24 : vector<1x1xf32> to vector<1x128xf32>
    %26 = arith.addf %23, %25 : vector<1x128xf32>
    %27 = vector.broadcast %18 : vector<128x1xf32> to vector<128x128xf32>
    %28 = arith.mulf %16, %27 : vector<128x128xf32>
    %cst_18 = arith.constant dense<0.000000e+00> : vector<128xf32>
    %29 = vector.multi_reduction <add>, %28, %cst_18 [0] : vector<128x128xf32> to vector<128xf32>
    %30 = vector.shape_cast %29 : vector<128xf32> to vector<1x128xf32>
    %31 = vector.extract_strided_slice %19 {offsets = [0, 1], sizes = [1, 1], strides = [1, 1]} : vector<1x2xf32> to vector<1x1xf32>
    %32 = vector.broadcast %31 : vector<1x1xf32> to vector<1x128xf32>
    %33 = arith.addf %30, %32 : vector<1x128xf32>
    %cst_19 = arith.constant -1.60943794 : f32
    %34 = vector.broadcast %cst_19 : f32 to vector<1x128xf32>
    %35 = arith.subf %34, %33 : vector<1x128xf32>
    %cst_20 = arith.constant 0.000000e+00 : f32
    %36 = vector.broadcast %cst_20 : f32 to vector<1x128xf32>
    %37 = arith.maximumf %35, %36 : vector<1x128xf32>
    %38 = math.absf %35 : vector<1x128xf32>
    %cst_21 = arith.constant 0.000000e+00 : f32
    %39 = vector.broadcast %cst_21 : f32 to vector<1x128xf32>
    %40 = arith.subf %39, %38 : vector<1x128xf32>
    %41 = math.exp %40 : vector<1x128xf32>
    %42 = math.log1p %41 : vector<1x128xf32>
    %43 = arith.addf %37, %42 : vector<1x128xf32>
    %cst_22 = arith.constant -1.60943794 : f32
    %44 = vector.broadcast %cst_22 : f32 to vector<1x128xf32>
    %45 = arith.subf %44, %43 : vector<1x128xf32>
    %cst_23 = arith.constant -2.30258512 : f32
    %46 = vector.broadcast %cst_23 : f32 to vector<1x128xf32>
    %47 = arith.subf %45, %46 : vector<1x128xf32>
    %cst_24 = arith.constant 0.000000e+00 : f32
    %48 = vector.broadcast %cst_24 : f32 to vector<1x128xf32>
    %49 = arith.maximumf %47, %48 : vector<1x128xf32>
    %50 = math.absf %47 : vector<1x128xf32>
    %cst_25 = arith.constant 0.000000e+00 : f32
    %51 = vector.broadcast %cst_25 : f32 to vector<1x128xf32>
    %52 = arith.subf %51, %50 : vector<1x128xf32>
    %53 = math.exp %52 : vector<1x128xf32>
    %54 = math.log1p %53 : vector<1x128xf32>
    %55 = arith.addf %49, %54 : vector<1x128xf32>
    %cst_26 = arith.constant -2.30258512 : f32
    %56 = vector.broadcast %cst_26 : f32 to vector<1x128xf32>
    %57 = arith.addf %56, %55 : vector<1x128xf32>
    %58 = math.exp %57 : vector<1x128xf32>
    %c0_27 = arith.constant 0 : index
    %c0_28 = arith.constant 0 : index
    %59 = vector.load %arg8[%c0_27, %c0_28] : memref<2x128xf32, #tpu.memory_space<vmem>>, vector<1x128xf32>
    tpu.vector_store %arg8[%c0_27, %c0_28], %26 {strides = array<i32>} : memref<2x128xf32, #tpu.memory_space<vmem>>, vector<1x128xf32>,
    %c1_29 = arith.constant 1 : index
    %c0_30 = arith.constant 0 : index
    %60 = vector.load %arg8[%c1_29, %c0_30] : memref<2x128xf32, #tpu.memory_space<vmem>>, vector<1x128xf32>
    tpu.vector_store %arg8[%c1_29, %c0_30], %58 {strides = array<i32>} : memref<2x128xf32, #tpu.memory_space<vmem>>, vector<1x128xf32>,
    return
  }
  func.func @transform_0(%arg0: i32) -> (i32, i32) {
    %c0_i32 = arith.constant 0 : i32
    %c0_i32_0 = arith.constant 0 : i32
    return %c0_i32, %arg0 : i32, i32
  }
  func.func @transform_1(%arg0: i32) -> (i32, i32) {
    %c0_i32 = arith.constant 0 : i32
    %c0_i32_0 = arith.constant 0 : i32
    %c0_i32_1 = arith.constant 0 : i32
    return %c0_i32, %c0_i32_0 : i32, i32
  }
  func.func @transform_2(%arg0: i32) -> (i32, i32) {
    %c0_i32 = arith.constant 0 : i32
    %c0_i32_0 = arith.constant 0 : i32
    %c0_i32_1 = arith.constant 0 : i32
    return %c0_i32, %c0_i32_0 : i32, i32
  }
  func.func @transform_3(%arg0: i32) -> (i32, i32) {
    %c0_i32 = arith.constant 0 : i32
    %c0_i32_0 = arith.constant 0 : i32
    %c0_i32_1 = arith.constant 0 : i32
    return %c0_i32, %c0_i32_0 : i32, i32
  }
  func.func @transform_4(%arg0: i32) -> (i32, i32) {
    %c0_i32 = arith.constant 0 : i32
    %c0_i32_0 = arith.constant 0 : i32
    %c0_i32_1 = arith.constant 0 : i32
    return %c0_i32, %c0_i32_0 : i32, i32
  }
  func.func @transform_5(%arg0: i32) -> (i32, i32) {
    %c0_i32 = arith.constant 0 : i32
    %c0_i32_0 = arith.constant 0 : i32
    %c0_i32_1 = arith.constant 0 : i32
    return %c0_i32, %c0_i32_0 : i32, i32
  }
  func.func @transform_6(%arg0: i32) -> (i32, i32) {
    %c0_i32 = arith.constant 0 : i32
    %c0_i32_0 = arith.constant 0 : i32
    %c0_i32_1 = arith.constant 0 : i32
    return %c0_i32, %c0_i32_0 : i32, i32
  }
  func.func @transform_7(%arg0: i32) -> (i32, i32) {
    %c0_i32 = arith.constant 0 : i32
    %c0_i32_0 = arith.constant 0 : i32
    return %c0_i32, %arg0 : i32, i32
  }
}

</mosaic_0001>

<bundles_post_ra>
// kernel: tpu_custom_call.1
= control target key start
LH: loop header
LB: loop body
LE: loop exit
PB: predicated region body
PF: predicated region fallthrough
CT: control target
= control target key end

     0   :  { %12 = vsyncpa [#allocation4], 0  ;;  %s2006_s0 = inlined_call_operand.vmem [shape: f32[32,256], index: 0, kind: input, shape index: {}]   ;;  %s2007_s1 = inlined_call_operand.vmem [shape: bf16[128,32], index: 1, kind: input, shape index: {}]   ;;  %s2008_s2 = inlined_call_operand.vmem [shape: f32[128,1], index: 2, kind: input, shape index: {}]   ;;  %s2009_s3 = inlined_call_operand.vmem [shape: bf16[128,128], index: 3, kind: input, shape index: {}]   ;;  %s2010_s4 = inlined_call_operand.vmem [shape: f32[128,1], index: 4, kind: input, shape index: {}]   ;;  %s2011_s5 = inlined_call_operand.vmem [shape: f32[128,2], index: 5, kind: input, shape index: {}]   ;;  %s2012_s6 = inlined_call_operand.vmem [shape: f32[1,2], index: 6, kind: input, shape index: {}]   ;;  %s2013_s7 = inlined_call_operand.hbm [shape: f32[2,256], index: 7, kind: output, shape index: {}]  }
   0x1   :  { %14 = vsyncpa [#allocation4 + $0x1], 0  ;;  %s1586_s24 = smov 0   ;;  %s1588_s25 = smov 0  }
   0x2   :  { %s1590_s26 = smov 0   ;;  %s1592_s27 = smov 0  }
   0x3 LB: > { %s1271_s28 = sadd.s32 4294967295, %s1541_s27   ;;  %s1272_s29 = sadd.s32 4294967294, %s1541_s27   ;;  %s1541_s27 = sphi %s1592_s27, %s2019_s27   ;;  %s1537_s26 = sphi %s1590_s26, %s2018_s26   ;;  %s1533_s25 = sphi %s1588_s25, %s2017_s25   ;;  %s1529_s24 = sphi %s1586_s24, %s2016_s24  }
   0x4   : > { %s1609_s30 = sadd.s32 1, %s1541_s27   ;;  %s27_s8 = sadd.s32 1, %s1537_s26 }
   0x5   : > { %s24_s9 = ssub.s32 %s1541_s27, %s1609_s30  ;;  %p34_p0 = scmp.ne.s32.totalorder %s1537_s26, %s1533_s25 }
   0x6   : > { %p25_p1 = scmp.eq.s32.totalorder %s24_s9, 0  ;;  %p35_p2 = scmp.eq.s32.totalorder %s1541_s27, 0 }
   0x7   : > { %p190_p3 = scmp.eq.s32.totalorder %s1271_s28, 1  ;;  %p195_p4 = scmp.ne.s32.totalorder %s1533_s25, %s1529_s24 }
   0x8   : > { %s1622_s10 = scalar_select %p25_p1, %s1537_s26, %s27_s8  }
   0x9   : > { %p36_p5 = por %p35_p2, %p34_p0  ;;  %p1624_p6 = por %p190_p3, %p34_p0 }
   0xa   : > { %p196_p7 = scmp.eq.s32.totalorder %s1272_s29, 1  ;;  %p1274_p9 = scmp.ge.s32.totalorder %s1541_s27, 2 }
   0xc   : > { %p1628_p8 = por %p196_p7, %p195_p4  ;;  %230 = sbr.rel (%p1274_p9) target bundleno = 26 (0x1a), region = 40 }
  0x13   : > { %233 = sbr.rel (!%p36_p5) target bundleno = 26 (0x1a), region = 44  ;;  %s235_s13 = sand.u32 (%p36_p5), 1, %s1537_s26  }
  0x14   : > { %s1276_s14 = sshll.u32 (%p36_p5), %s1541_s27, 3  ;;  %s1275_s15 = sshll.u32 (%p36_p5), %s235_s13, 5 }
  0x15   : > { %s239_s18 = scalar_lea.vmem (%p36_p5), %s2006_s0, %s1276_s14  ;;  %s237_s19 = scalar_lea.vmem (%p36_p5), [#allocation2], %s1275_s15 }
  0x16   : > { %v273_v0 = vld [vmem:[%s239_s18] sm:$0xff] (%p36_p5)  ;;  %v275_v1 = vld [vmem:[%s239_s18 + $0x10] sm:$0xff] (%p36_p5) }
  0x17   : > { %v277_v2 = vld [vmem:[%s239_s18 + $0x20] sm:$0xff] (%p36_p5)  ;;  %274 = vst [vmem:[%s237_s19] sm:$0xff] (%p36_p5), %v273_v0  ;;  %276 = vst [vmem:[%s237_s19 + $0x8] sm:$0xff] (%p36_p5), %v275_v1  ;;  %v279_v3 = vld [vmem:[%s239_s18 + $0x30] sm:$0xff] (%p36_p5) }
  0x18   : > { %278 = vst [vmem:[%s237_s19 + $0x10] sm:$0xff] (%p36_p5), %v277_v2  ;;  %280 = vst [vmem:[%s237_s19 + $0x18] sm:$0xff] (%p36_p5), %v279_v3 }
  0x1a PF: > { %p1277_p10 = scmp.ge.s32.totalorder %s1541_s27, 1  ;;  %p285_p11 = scmp.lt.s32.totalorder %s1541_s27, 3 }
  0x1c   : > { %p286_p12 = pnand %p1277_p10, %p285_p11 }
  0x1d   : > { %s1643_s20 = sand.u32 (!%p286_p12), 1, %s1533_s25   ;;  %v1453_v4 = vld [vmem:[%s2007_s1] sm:$0xff] (!%p286_p12)   ;;  %vm482_vm0 = vcmask (!%p286_p12), 261120   ;;  %v1543_v10 = vmov (!%p286_p12), 0   ;;  %v1454_v13 = vld [vmem:[%s2007_s1 + $0x8] sm:$0xff] (!%p286_p12)   ;;  %v348_v14 = vld [vmem:[%s2008_s2 + $0x10] sm:$0xff] (!%p286_p12) }
  0x1e   : > { %289 = sbr.rel (%p286_p12) target bundleno = 666 (0x29a), region = 82  ;;  %s1278_s23 = sshll.u32 (!%p286_p12), %s1643_s20, 5  ;;  %1339 = vmatprep.mubr.msk.bf16.mxu0 (!%p286_p12), %vm482_vm0, %v1453_v4  ;;  %1444 = vset.pattern.permute.xlu0 (!%p286_p12), %v1543_v10  ;;  %v346_v12 = vld [vmem:[%s2008_s2] sm:$0xff] (!%p286_p12)  ;;  %v1455_v15 = vld [vmem:[%s2007_s1 + $0x10] sm:$0xff] (!%p286_p12)   ;;  %v347_v16 = vld [vmem:[%s2008_s2 + $0x8] sm:$0xff] (!%p286_p12)  ;;  %v1544_v42 = vmov (!%p286_p12), 1  }
  0x1f   : > { %s294_s29 = scalar_lea.vmem (!%p286_p12), [#allocation2], %s1278_s23  ;;  %1445 = vset.pattern.permute.xlu1 (!%p286_p12), %v1543_v10  ;;  %364 = vperm.xlu0 (!%p286_p12), %1444, %v346_v12   ;;  %v349_v17 = vld [vmem:[%s2008_s2 + $0x18] sm:$0xff] (!%p286_p12)  ;;  %v350_v18 = vld [vmem:[%s2008_s2 + $0x20] sm:$0xff] (!%p286_p12)  ;;  %v351_v20 = vld [vmem:[%s2008_s2 + $0x28] sm:$0xff] (!%p286_p12)  ;;  %s1279_s23 = sshll.u32 (!%p286_p12), %s1643_s20, 1 }
  0x20   : > { %v324_v5 = vld [vmem:[%s294_s29] sm:$0xff] (!%p286_p12)  ;;  %v325_v6 = vld [vmem:[%s294_s29 + $0x8] sm:$0xff] (!%p286_p12)  ;;  %v326_v7 = vld [vmem:[%s294_s29 + $0x10] sm:$0xff] (!%p286_p12)  ;;  %374 = vperm.xlu1 (!%p286_p12), %1445, %v348_v14   ;;  %s1306_s8 = sshll.u32 (!%p286_p12), %s1271_s28, 5  ;;  %s1194_s16 = scalar_lea.sflag (!%p286_p12), [#allocation4], %s1643_s20 }
  0x21   : > { %v328_v8 = vpack.c.bf16 (!%p286_p12), %v325_v6, %v324_v5  ;;  %v327_v9 = vld [vmem:[%s294_s29 + $0x18] sm:$0xff] (!%p286_p12)  ;;  %v1457_v21 = vld [vmem:[%s2007_s1 + $0x20] sm:$0xff] (!%p286_p12)   ;;  %v352_v22 = vld [vmem:[%s2008_s2 + $0x30] sm:$0xff] (!%p286_p12)  ;;  %s1952_s29 = scalar_lea.vmem (!%p286_p12), [#allocation3], %s1279_s23  ;;  %s1961_s15 = scalar_lea.hbm (!%p286_p12), %s2013_s7, %s1306_s8 }
  0x22   : > { %v329_v11 = vpack.c.bf16 (!%p286_p12), %v327_v9, %v326_v7  ;;  %v1456_v19 = vld [vmem:[%s2007_s1 + $0x18] sm:$0xff] (!%p286_p12)   ;;  %v354_v24 = vld [vmem:[%s2008_s2 + $0x40] sm:$0xff] (!%p286_p12)  ;;  %v355_v25 = vld [vmem:[%s2008_s2 + $0x48] sm:$0xff] (!%p286_p12)  ;;  %s1207_s9 = sshll.u32 (!%p286_p12), %s1952_s29, 4  ;;  %s1545_s28 = smov (!%p286_p12), [#allocation3]   ;;  %s1963_s9 = int_to_ptr.vmem [resolvable:$true] %s1207_s9 }
  0x23   : > { %1335 = vmatprep.subr.bf16.mxu0 (!%p286_p12), %v328_v8  ;;  %369 = vperm.xlu0 (!%p286_p12), %1444, %v347_v16   ;;  %v353_v23 = vld [vmem:[%s2008_s2 + $0x38] sm:$0xff] (!%p286_p12)  ;;  %v1458_v26 = vld [vmem:[%s2007_s1 + $0x28] sm:$0xff] (!%p286_p12)   ;;  %v1459_v27 = vld [vmem:[%s2007_s1 + $0x30] sm:$0xff] (!%p286_p12)   ;;  %s1479_s17 = scalar_lea.vmem (!%p286_p12), %s1963_s9, 32  ;;  %s1483_s18 = sshll.u32 (!%p286_p12), %s1545_s28, 4  ;;  %s1484_s18 = int_to_ptr.vmem [resolvable:$false] %s1483_s18 }
  0x24   : > { %1336 = vmatpush3.bf16.msra.mxu0 (!%p286_p12), %v328_v8  ;;  %379 = vperm.xlu1 (!%p286_p12), %1445, %v349_v17   ;;  %v356_v28 = vld [vmem:[%s2008_s2 + $0x50] sm:$0xff] (!%p286_p12)  ;;  %v357_v29 = vld [vmem:[%s2008_s2 + $0x58] sm:$0xff] (!%p286_p12)  ;;  %v358_v30 = vld [vmem:[%s2008_s2 + $0x60] sm:$0xff] (!%p286_p12)  ;;  %p1480_p13 = scmp.ne.s32.totalorder (!%p286_p12), %s1963_s9, %s1479_s17  ;;  %s1485_s19 = scalar_lea.vmem (!%p286_p12), %s1484_s18, 64 }
  0x25   : > { %1337 = vmatprep.subr.bf16.mxu0 %v329_v11  ;;  %v359_v31 = vld [vmem:[%s2008_s2 + $0x68] sm:$0xff]  ;;  %v1460_v32 = vld [vmem:[%s2007_s1 + $0x38] sm:$0xff]   ;;  %v360_v33 = vld [vmem:[%s2008_s2 + $0x70] sm:$0xff]  ;;  %p1486_p2 = scmp.lt.s32.totalorder %s1963_s9, %s1484_s18  ;;  %p1487_p3 = scmp.lt.s32.totalorder %s1485_s19, %s1479_s17 }
  0x26   : > { %v361_v34 = vld [vmem:[%s2008_s2 + $0x78] sm:$0xff]  ;;  %v644_v35 = vld [vmem:[%s2010_s4] sm:$0xff]  ;;  %v645_v36 = vld [vmem:[%s2010_s4 + $0x8] sm:$0xff]  ;;  %p1481_p0 = pnand %p1480_p13, %p1624_p6 }
  0x27   : > { %384 = vperm.xlu0 %1444, %v350_v18   ;;  %v646_v37 = vld [vmem:[%s2010_s4 + $0x10] sm:$0xff]  ;;  %v647_v38 = vld [vmem:[%s2010_s4 + $0x18] sm:$0xff]  ;;  %v1461_v39 = vld [vmem:[%s2009_s3] sm:$0xff]   ;;  %p1488_p4 = por %p1487_p3, %p1486_p2 }
  0x28   : > { %1338 = vmatpush3.bf16.msra.mxu0 %v329_v11  ;;  %389 = vperm.xlu1 %1445, %v351_v20   ;;  %v1462_v40 = vld [vmem:[%s2009_s3 + $0x10] sm:$0xff]   ;;  %v1749_v41 = vld [vmem:[%s2011_s5 + $0x8] sm:$0xff]  ;;  %v901_v43 = vld [vmem:[%s2011_s5] sm:$0xff]  ;;  %p1482_p1 = pneg %p1481_p0 }
  0x29   : > { %1375 = vmatprep.mubr.bf16.mxu1 %v1462_v40  ;;  %v648_v44 = vld [vmem:[%s2010_s4 + $0x20] sm:$0xff]  ;;  %v1764_v45 = vld [vmem:[%s2011_s5 + $0x10] sm:$0xff]  ;;  %v649_v46 = vld [vmem:[%s2010_s4 + $0x28] sm:$0xff] }
  0x2a   : > { %v904_v47 = vld [vmem:[%s2011_s5 + $0x18] sm:$0xff]  ;;  %v650_v48 = vld [vmem:[%s2010_s4 + $0x30] sm:$0xff]  ;;  %v905_v49 = vld [vmem:[%s2011_s5 + $0x20] sm:$0xff]  ;;  %p1489_p5 = pnand %p1488_p4, %p1482_p1 }
  0x2b   : > { %1340 = vmatmul.mubr.msk.bf16.vlgmr.msra.gmra.mrb[0].mxu0 %vm482_vm0, %v1454_v13  ;;  %394 = vperm.xlu0 %1444, %v352_v22   ;;  %v651_v50 = vld [vmem:[%s2010_s4 + $0x38] sm:$0xff]  ;;  %v906_v51 = vld [vmem:[%s2011_s5 + $0x28] sm:$0xff]  ;;  %v652_v52 = vld [vmem:[%s2010_s4 + $0x40] sm:$0xff] }
  0x2c   : > { %1343 = vmatprep.mubr.msk.bf16.mxu0 %vm482_vm0, %v1455_v15  ;;  %399 = vperm.xlu1 %1445, %v353_v23   ;;  %v907_v53 = vld [vmem:[%s2011_s5 + $0x30] sm:$0xff]  ;;  %v653_v54 = vld [vmem:[%s2010_s4 + $0x48] sm:$0xff]  ;;  %v908_v55 = vld [vmem:[%s2011_s5 + $0x38] sm:$0xff] }
  0x2d   : > { %v654_v56 = vld [vmem:[%s2010_s4 + $0x50] sm:$0xff]  ;;  %v909_v57 = vld [vmem:[%s2011_s5 + $0x40] sm:$0xff]  ;;  %v655_v58 = vld [vmem:[%s2010_s4 + $0x58] sm:$0xff] }
  0x2e   : > { %v910_v59 = vld [vmem:[%s2011_s5 + $0x48] sm:$0xff]  ;;  %v656_v60 = vld [vmem:[%s2010_s4 + $0x60] sm:$0xff]  ;;  %v911_v61 = vld [vmem:[%s2011_s5 + $0x50] sm:$0xff] }
  0x2f   : > { %404 = vperm.xlu0 %1444, %v354_v24   ;;  %v657_v62 = vld [vmem:[%s2010_s4 + $0x68] sm:$0xff]  ;;  %v912_v63 = vld [vmem:[%s2011_s5 + $0x58] sm:$0xff]  ;;  %v658_v0 = vld [vmem:[%s2010_s4 + $0x70] sm:$0xff] }
  0x30   : > { %409 = vperm.xlu1 %1445, %v355_v25   ;;  %v1827_v1 = vld [vmem:[%s2011_s5 + $0x60] sm:$0xff]  ;;  %v659_v2 = vld [vmem:[%s2010_s4 + $0x78] sm:$0xff]  ;;  %v914_v3 = vld [vmem:[%s2011_s5 + $0x68] sm:$0xff] }
  0x31   : > { %v1839_v4 = vld [vmem:[%s2011_s5 + $0x78] sm:$0xff]  ;;  %v1844_v5 = vld [vmem:[%s2011_s5 + $0x70] sm:$0xff]  ;;  %v1852_v6 = vld [vmem:[%s2012_s6] sm:$0x1] }
  0x33   : > { %1344 = vmatmul.mubr.msk.bf16.gmra.mrb[4].mxu0 %vm482_vm0, %v1456_v19  ;;  %414 = vperm.xlu0 %1444, %v356_v28  }
  0x34   : > { %1347 = vmatprep.mubr.msk.bf16.mxu0 %vm482_vm0, %v1457_v21  ;;  %419 = vperm.xlu1 %1445, %v357_v29  }
  0x37   : > { %424 = vperm.xlu0 %1444, %v358_v30  }
  0x38   : > { %429 = vperm.xlu1 %1445, %v359_v31  }
  0x3b   : > { %1348 = vmatmul.mubr.msk.bf16.gmra.mrb[8].mxu0 %vm482_vm0, %v1458_v26  ;;  %434 = vperm.xlu0 %1444, %v360_v33  }
  0x3c   : > { %1351 = vmatprep.mubr.msk.bf16.mxu0 %vm482_vm0, %v1459_v27  ;;  %439 = vperm.xlu1 %1445, %v361_v34  }
  0x3f   : > { %662 = vperm.xlu0 %1444, %v644_v35  }
  0x40   : > { %667 = vperm.xlu1 %1445, %v645_v36  }
  0x43   : > { %1352 = vmatmul.mubr.msk.bf16.gmra.mrb[12].mxu0 %vm482_vm0, %v1460_v32  ;;  %672 = vperm.xlu0 %1444, %v646_v37  }
  0x44   : > { %677 = vperm.xlu1 %1445, %v647_v38   ;;  %1371 = vmatprep.mubr.bf16.mxu0 %v1461_v39 }
  0x47   : > { %1446 = vset.pattern.permute.xlu0 %v1544_v42 }
  0x48   : > { %1447 = vset.pattern.permute.xlu1 %v1544_v42  ;;  %1046 = vperm.xlu0 %1446, %v901_v43  }
  0x49   : > { %1050 = vperm.xlu1 %1447, %v1749_v41  }
  0x4c   : > { %1054 = vperm.xlu0 %1446, %v1764_v45  }
  0x4d   : > { %1448 = vset.pattern.permute.xlu1 %v1543_v10 }
  0x4e   : > { %682 = vperm.xlu1 %1448, %v648_v44  }
  0x50   : > { %1058 = vperm.xlu0 %1446, %v904_v47  }
  0x52   : > { %687 = vperm.xlu1 %1448, %v649_v46  }
  0x54   : > { %1062 = vperm.xlu0 %1446, %v905_v49  }
  0x56   : > { %692 = vperm.xlu1 %1448, %v650_v48  }
  0x58   : > { %1066 = vperm.xlu0 %1446, %v906_v51  }
  0x5a   : > { %697 = vperm.xlu1 %1448, %v651_v50  }
  0x5c   : > { %1070 = vperm.xlu0 %1446, %v907_v53  }
  0x5e   : > { %702 = vperm.xlu1 %1448, %v652_v52  }
  0x60   : > { %1074 = vperm.xlu0 %1446, %v908_v55  }
  0x62   : > { %707 = vperm.xlu1 %1448, %v653_v54  }
  0x64   : > { %1078 = vperm.xlu0 %1446, %v909_v57  }
  0x66   : > { %712 = vperm.xlu1 %1448, %v654_v56  }
  0x68   : > { %1082 = vperm.xlu0 %1446, %v910_v59  }
  0x6a   : > { %717 = vperm.xlu1 %1448, %v655_v58  }
  0x6c   : > { %1086 = vperm.xlu0 %1446, %v911_v61  }
  0x6e   : > { %722 = vperm.xlu1 %1448, %v656_v60  }
  0x70   : > { %1090 = vperm.xlu0 %1446, %v912_v63  }
  0x72   : > { %727 = vperm.xlu1 %1448, %v657_v62  }
  0x74   : > { %1094 = vperm.xlu0 %1446, %v1827_v1  }
  0x76   : > { %732 = vperm.xlu1 %1448, %v658_v0  }
  0x78   : > { %1098 = vperm.xlu0 %1446, %v914_v3  }
  0x7a   : > { %737 = vperm.xlu1 %1448, %v659_v2  }
  0x7c   : > { %1106 = vperm.xlu0 %1446, %v1839_v4  }
  0x7e   : > { %1449 = vset.pattern.permute.xlu1 %v1544_v42 }
  0x7f   : > { %1102 = vperm.xlu1 %1449, %v1844_v5  }
  0x80   : > { %1450 = vset.pattern.permute.xlu0 %v1543_v10 }
  0x81   : > { %920 = vperm.xlu0 %1450, %v901_v43  }
  0x83   : > { %1147 = vperm.xlu1 %1449, %v1852_v6  }
  0x85   : > { %935 = vperm.xlu0 %1450, %v904_v47  }
  0x87   : > { %1451 = vset.pattern.permute.xlu1 %v1543_v10 }
  0x88   : > { %925 = vperm.xlu1 %1451, %v1749_v41  }
  0x89   : > { %945 = vperm.xlu0 %1450, %v906_v51  }
  0x8c   : > { %930 = vperm.xlu1 %1451, %v1764_v45  }
  0x8d   : > { %955 = vperm.xlu0 %1450, %v908_v55  }
  0x90   : > { %940 = vperm.xlu1 %1451, %v905_v49  }
  0x91   : > { %965 = vperm.xlu0 %1450, %v910_v59  }
  0x94   : > { %950 = vperm.xlu1 %1451, %v907_v53  }
  0x95   : > { %975 = vperm.xlu0 %1450, %v912_v63  }
  0x98   : > { %960 = vperm.xlu1 %1451, %v909_v57  }
  0x99   : > { %985 = vperm.xlu0 %1450, %v914_v3  }
  0x9c   : > { %970 = vperm.xlu1 %1451, %v911_v61  }
  0x9d   : > { %995 = vperm.xlu0 %1450, %v1839_v4  }
  0x9e   : > { %v365_v7 = vpop.permute.xlu0 %364 }
  0x9f   : > { %v375_v8 = vpop.permute.xlu1 %374 }
  0xa0   : > { %980 = vperm.xlu1 %1451, %v1827_v1  }
  0xa1   : > { %1452 = vset.pattern.permute.xlu0 %v1544_v42 }
  0xa2   : > { %v370_v9 = vpop.permute.xlu0 %369 }
  0xa3   : > { %v380_v11 = vpop.permute.xlu1 %379 }
  0xa4   : > { %990 = vperm.xlu1 %1451, %v1844_v5  }
  0xa6   : > { %v385_v12 = vpop.permute.xlu0 %384 }
  0xa7   : > { %v390_v13 = vpop.permute.xlu1 %389 }
  0xa8   : > { %1037 = vperm.xlu1 %1451, %v1852_v6  }
  0xaa   : > { %v395_v14 = vpop.permute.xlu0 %394 }
  0xab   : > { %v400_v18 = vpop.permute.xlu1 %399 }
  0xae   : > { %v405_v25 = vpop.permute.xlu0 %404 }
  0xaf   : > { %v410_v29 = vpop.permute.xlu1 %409 }
  0xb2   : > { %v415_v38 = vpop.permute.xlu0 %414 }
  0xb3   : > { %v420_v43 = vpop.permute.xlu1 %419 }
  0xb6   : > { %v425_v51 = vpop.permute.xlu0 %424 }
  0xb7   : > { %v430_v56 = vpop.permute.xlu1 %429 }
  0xba   : > { %v435_v62 = vpop.permute.xlu0 %434 }
  0xbb   : > { %v440_v3 = vpop.permute.xlu1 %439 }
  0xfe   : > { %v1341_v15 = vpop.f32.mrb[0].mxu0 }
  0xff   : > { %v550_v16 = vadd.f32 %v1341_v15, %v375_v8  ;;  %v541_v17 = vpop.f32.mrb[1].mxu0 }
 0x100   : > { %v542_v19 = vadd.f32 %v541_v17, %v365_v7  ;;  %v1342_v10 = vpop.f32.mrb[2].mxu0  ;;  %v1464_v17 = vld [vmem:[%s2009_s3 + $0x18] sm:$0xff]  }
 0x101   : > { %v553_v20 = vadd.f32 %v1342_v10, %v380_v11  ;;  %v544_v21 = vpop.f32.mrb[3].mxu0  ;;  %v606_v23 = vmax.f32 %v550_v16, 0.0  ;;  %v1463_v16 = vld [vmem:[%s2009_s3 + $0x8] sm:$0xff]   ;;  %v1467_v10 = vld [vmem:[%s2009_s3 + $0x30] sm:$0xff]  }
 0x102   : > { %v545_v22 = vadd.f32 %v544_v21, %v370_v9  ;;  %v604_v26 = vmax.f32 %v542_v19, 0.0  ;;  %v1466_v19 = vld [vmem:[%s2009_s3 + $0x28] sm:$0xff]   ;;  %v668_v21 = vpop.permute.xlu1 %667 }
 0x103   : > { %v607_v24 = vmax.f32 %v553_v20, 0.0  ;;  %v1468_v20 = vld [vmem:[%s2009_s3 + $0x38] sm:$0xff]  }
 0x104   : > { %v605_v27 = vmax.f32 %v545_v22, 0.0 }
 0x105   : > { %v637_v28 = vpack.c.bf16 %v607_v24, %v606_v23  ;;  %v663_v24 = vpop.permute.xlu0 %662 }
 0x106   : > { %v636_v30 = vpack.c.bf16 %v605_v27, %v604_v26  ;;  %v1345_v31 = vpop.f32.mrb[4].mxu0  ;;  %v678_v22 = vpop.permute.xlu1 %677 }
 0x107   : > { %v566_v32 = vadd.f32 %v1345_v31, %v395_v14  ;;  %v557_v33 = vpop.f32.mrb[5].mxu0 }
 0x108   : > { %v558_v34 = vadd.f32 %v557_v33, %v385_v12  ;;  %v1346_v35 = vpop.f32.mrb[6].mxu0  ;;  %1355 = vmatprep.subr.bf16.mxu0 %v636_v30  ;;  %1387 = vmatprep.subr.bf16.mxu1 %v636_v30 }
 0x109   : > { %v569_v36 = vadd.f32 %v1346_v35, %v400_v18  ;;  %v560_v37 = vpop.f32.mrb[7].mxu0  ;;  %1356 = vmatpush3.bf16.msra.mxu0 %v636_v30  ;;  %1395 = vmatpush3.bf16.msra.mxu1 %v636_v30  ;;  %v610_v40 = vmax.f32 %v566_v32, 0.0  ;;  %v1465_v18 = vld [vmem:[%s2009_s3 + $0x20] sm:$0xff]   ;;  %v673_v26 = vpop.permute.xlu0 %672 }
 0x10a   : > { %v561_v39 = vadd.f32 %v560_v37, %v390_v13  ;;  %1357 = vmatprep.subr.bf16.mxu0 %v637_v28  ;;  %1388 = vmatprep.subr.bf16.mxu1 %v637_v28  ;;  %v608_v44 = vmax.f32 %v558_v34, 0.0  ;;  %v1051_v23 = vpop.permute.xlu1 %1050 }
 0x10b   : > { %v611_v41 = vmax.f32 %v569_v36, 0.0 }
 0x10c   : > { %v609_v45 = vmax.f32 %v561_v39, 0.0 }
 0x10d   : > { %v639_v46 = vpack.c.bf16 %v611_v41, %v610_v40  ;;  %1358 = vmatpush3.bf16.msra.mxu0 %v637_v28  ;;  %1396 = vmatpush3.bf16.msra.mxu1 %v637_v28  ;;  %v1047_v28 = vpop.permute.xlu0 %1046 }
 0x10e   : > { %v638_v47 = vpack.c.bf16 %v609_v45, %v608_v44  ;;  %v1349_v48 = vpop.f32.mrb[8].mxu0 }
 0x10f   : > { %v582_v49 = vadd.f32 %v1349_v48, %v415_v38  ;;  %v573_v50 = vpop.f32.mrb[9].mxu0 }
 0x110   : > { %v574_v52 = vadd.f32 %v573_v50, %v405_v25  ;;  %v1350_v53 = vpop.f32.mrb[10].mxu0  ;;  %1359 = vmatprep.subr.bf16.mxu0 %v638_v47  ;;  %1389 = vmatprep.subr.bf16.mxu1 %v638_v47  ;;  %v683_v25 = vpop.permute.xlu1 %682 }
 0x111   : > { %v585_v54 = vadd.f32 %v1350_v53, %v420_v43  ;;  %v576_v55 = vpop.f32.mrb[11].mxu0  ;;  %1360 = vmatpush3.bf16.msra.mxu0 %v638_v47  ;;  %1397 = vmatpush3.bf16.msra.mxu1 %v638_v47  ;;  %v614_v58 = vmax.f32 %v582_v49, 0.0  ;;  %v1055_v30 = vpop.permute.xlu0 %1054 }
 0x112   : > { %v577_v57 = vadd.f32 %v576_v55, %v410_v29  ;;  %1361 = vmatprep.subr.bf16.mxu0 %v639_v46  ;;  %1390 = vmatprep.subr.bf16.mxu1 %v639_v46  ;;  %v612_v60 = vmax.f32 %v574_v52, 0.0 }
 0x113   : > { %v615_v59 = vmax.f32 %v585_v54, 0.0 }
 0x114   : > { %v613_v61 = vmax.f32 %v577_v57, 0.0  ;;  %v688_v27 = vpop.permute.xlu1 %687 }
 0x115   : > { %v641_v42 = vpack.c.bf16 %v615_v59, %v614_v58  ;;  %1362 = vmatpush3.bf16.msra.mxu0 %v639_v46  ;;  %1398 = vmatpush3.bf16.msra.mxu1 %v639_v46  ;;  %v1884_v32 = vpop.permute.xlu0 %1058 }
 0x116   : > { %v640_v63 = vpack.c.bf16 %v613_v61, %v612_v60  ;;  %v1353_v0 = vpop.f32.mrb[12].mxu0 }
 0x117   : > { %v598_v1 = vadd.f32 %v1353_v0, %v435_v62  ;;  %v589_v2 = vpop.f32.mrb[13].mxu0 }
 0x118   : > { %v590_v4 = vadd.f32 %v589_v2, %v425_v51  ;;  %v1354_v5 = vpop.f32.mrb[14].mxu0  ;;  %1363 = vmatprep.subr.bf16.mxu0 %v640_v63  ;;  %1391 = vmatprep.subr.bf16.mxu1 %v640_v63  ;;  %v693_v29 = vpop.permute.xlu1 %692 }
 0x119   : > { %v601_v7 = vadd.f32 %v1354_v5, %v440_v3  ;;  %v592_v8 = vpop.f32.mrb[15].mxu0  ;;  %1364 = vmatpush3.bf16.msra.mxu0 %v640_v63  ;;  %1399 = vmatpush3.bf16.msra.mxu1 %v640_v63  ;;  %v618_v9 = vmax.f32 %v598_v1, 0.0  ;;  %v1888_v34 = vpop.permute.xlu0 %1062 }
 0x11a   : > { %v593_v6 = vadd.f32 %v592_v8, %v430_v56  ;;  %1365 = vmatprep.subr.bf16.mxu0 %v641_v42  ;;  %1392 = vmatprep.subr.bf16.mxu1 %v641_v42  ;;  %v616_v12 = vmax.f32 %v590_v4, 0.0 }
 0x11b   : > { %v619_v11 = vmax.f32 %v601_v7, 0.0 }
 0x11c   : > { %v617_v13 = vmax.f32 %v593_v6, 0.0  ;;  %v1882_v31 = vpop.permute.xlu1 %697 }
 0x11d   : > { %v643_v14 = vpack.c.bf16 %v619_v11, %v618_v9  ;;  %1366 = vmatpush3.bf16.msra.mxu0 %v641_v42  ;;  %1400 = vmatpush3.bf16.msra.mxu1 %v641_v42  ;;  %v1892_v36 = vpop.permute.xlu0 %1066 }
 0x11e   : > { %v642_v15 = vpack.c.bf16 %v617_v13, %v616_v12 }
 0x120   : > { %1367 = vmatprep.subr.bf16.mxu0 %v642_v15  ;;  %1393 = vmatprep.subr.bf16.mxu1 %v642_v15  ;;  %v1886_v33 = vpop.permute.xlu1 %702 }
 0x121   : > { %1368 = vmatpush3.bf16.msra.mxu0 %v642_v15  ;;  %1401 = vmatpush3.bf16.msra.mxu1 %v642_v15  ;;  %v1896_v38 = vpop.permute.xlu0 %1070 }
 0x122   : > { %1369 = vmatprep.subr.bf16.mxu0 %v643_v14  ;;  %1394 = vmatprep.subr.bf16.mxu1 %v643_v14 }
 0x124   : > { %v1890_v35 = vpop.permute.xlu1 %707 }
 0x125   : > { %1370 = vmatpush3.bf16.msra.mxu0 %v643_v14  ;;  %1402 = vmatpush3.bf16.msra.mxu1 %v643_v14  ;;  %v1900_v40 = vpop.permute.xlu0 %1074 }
 0x128   : > { %1372 = vmatmul.mubr.bf16.vlgmr.msra.gmra.mrb[16].mxu0 %v1463_v16  ;;  %1376 = vmatmul.mubr.bf16.vlgmr.msra.gmra.mrb[0].mxu1 %v1464_v17  ;;  %v1894_v37 = vpop.permute.xlu1 %712 }
 0x129   : > { %1379 = vmatprep.mubr.bf16.mxu1 %v1465_v18  ;;  %v1904_v43 = vpop.permute.xlu0 %1078 }
 0x12c   : > { %v1898_v39 = vpop.permute.xlu1 %717 }
 0x12d   : > { %v1908_v45 = vpop.permute.xlu0 %1082 }
 0x130   : > { %1380 = vmatmul.mubr.bf16.gmra.mrb[4].mxu1 %v1466_v19  ;;  %v1902_v41 = vpop.permute.xlu1 %722 }
 0x131   : > { %1383 = vmatprep.mubr.bf16.mxu1 %v1467_v10  ;;  %v1912_v47 = vpop.permute.xlu0 %1086 }
 0x134   : > { %v1906_v44 = vpop.permute.xlu1 %727 }
 0x135   : > { %v1916_v49 = vpop.permute.xlu0 %1090 }
 0x138   : > { %1384 = vmatmul.mubr.bf16.gmra.mrb[8].mxu1 %v1468_v20  ;;  %v1910_v46 = vpop.permute.xlu1 %732 }
 0x139   : > { %v1920_v51 = vpop.permute.xlu0 %1094 }
 0x13c   : > { %v1914_v48 = vpop.permute.xlu1 %737 }
 0x13d   : > { %v1924_v53 = vpop.permute.xlu0 %1098 }
 0x140   : > { %v1918_v50 = vpop.permute.xlu1 %1102 }
 0x141   : > { %v1926_v55 = vpop.permute.xlu0 %1106 }
 0x144   : > { %v1922_v52 = vpop.permute.xlu1 %1147 }
 0x145   : > { %v921_v56 = vpop.permute.xlu0 %920 }
 0x148   : > { %v926_v54 = vpop.permute.xlu1 %925 }
 0x149   : > { %v936_v58 = vpop.permute.xlu0 %935 }
 0x14c   : > { %v931_v57 = vpop.permute.xlu1 %930 }
 0x14d   : > { %v946_v7 = vpop.permute.xlu0 %945 }
 0x150   : > { %v941_v59 = vpop.permute.xlu1 %940 }
 0x154   : > { %v951_v15 = vpop.permute.xlu1 %950 }
 0x1fb   : > { %v1373_v60 = vpop.f32.mrb[16].mxu0  ;;  %v1377_v61 = vpop.f32.mrb[0].mxu1 }
 0x1fc   : > { %v822_v42 = vpop.f32.mrb[17].mxu0  ;;  %v838_v62 = vpop.f32.mrb[1].mxu1  ;;  %v831_v2 = vadd.f32 %v1373_v60, %v673_v26 }
 0x1fd   : > { %v823_v63 = vadd.f32 %v822_v42, %v663_v24  ;;  %v1374_v0 = vpop.f32.mrb[18].mxu0  ;;  %v1378_v1 = vpop.f32.mrb[2].mxu1  ;;  %v839_v9 = vadd.f32 %v838_v62, %v683_v25  ;;  %v847_v24 = vadd.f32 %v1377_v61, %v693_v29 }
 0x1fe   : > { %v834_v3 = vadd.f32 %v1374_v0, %v678_v22  ;;  %v825_v4 = vpop.f32.mrb[19].mxu0  ;;  %v841_v5 = vpop.f32.mrb[3].mxu1  ;;  %v887_v11 = vmax.f32 %v831_v2, 0.0  ;;  %v850_v2 = vadd.f32 %v1378_v1, %v1882_v31 }
 0x1ff   : > { %v826_v8 = vadd.f32 %v825_v4, %v668_v21  ;;  %v885_v6 = vmax.f32 %v823_v63, 0.0  ;;  %v842_v14 = vadd.f32 %v841_v5, %v688_v27  ;;  %v889_v26 = vmax.f32 %v839_v9, 0.0  ;;  %v956_v22 = vpop.permute.xlu0 %955 }
 0x200   : > { %v888_v13 = vmax.f32 %v834_v3, 0.0  ;;  %v1000_v42 = vmul.f32 %v931_v57, %v887_v11  ;;  %v1111_v0 = vmul.f32 %v1055_v30, %v887_v11  ;;  %v892_v5 = vmax.f32 %v850_v2, 0.0 }
 0x201   : > { %v886_v12 = vmax.f32 %v826_v8, 0.0  ;;  %v998_v17 = vmul.f32 %v921_v56, %v885_v6  ;;  %v1109_v18 = vmul.f32 %v1047_v28, %v885_v6  ;;  %v890_v28 = vmax.f32 %v842_v14, 0.0 }
 0x202   : > { %v1001_v62 = vmul.f32 %v936_v58, %v888_v13  ;;  %v1112_v27 = vmul.f32 %v1884_v32, %v888_v13  ;;  %v1002_v61 = vmul.f32 %v941_v59, %v889_v26  ;;  %v1113_v4 = vmul.f32 %v1888_v34, %v889_v26 }
 0x203   : > { %v1381_v16 = vpop.f32.mrb[4].mxu1  ;;  %v999_v19 = vmul.f32 %v926_v54, %v886_v12  ;;  %v1110_v10 = vmul.f32 %v1051_v23, %v886_v12  ;;  %v891_v54 = vmax.f32 %v847_v24, 0.0  ;;  %v961_v23 = vpop.permute.xlu1 %960  ;;  %v1003_v31 = vmul.f32 %v946_v7, %v890_v28 }
 0x204   : > { %v854_v20 = vpop.f32.mrb[5].mxu1  ;;  %v966_v8 = vpop.permute.xlu0 %965  ;;  %v1114_v32 = vmul.f32 %v1892_v36, %v890_v28  ;;  %v863_v12 = vadd.f32 %v1381_v16, %v1894_v37  ;;  %v1116_v7 = vmul.f32 %v1900_v40, %v892_v5  ;;  %v1005_v24 = vmul.f32 %v956_v22, %v892_v5 }
 0x205   : > { %v1382_v60 = vpop.f32.mrb[6].mxu1  ;;  %v1014_v21 = vadd.f32 %v999_v19, %v998_v17  ;;  %v1125_v63 = vadd.f32 %v1110_v10, %v1109_v18  ;;  %v855_v29 = vadd.f32 %v854_v20, %v1886_v33  ;;  %v1115_v59 = vmul.f32 %v1896_v38, %v891_v54 }
 0x206   : > { %v857_v25 = vpop.f32.mrb[7].mxu1  ;;  %v1004_v14 = vmul.f32 %v951_v15, %v891_v54  ;;  %v866_v19 = vadd.f32 %v1382_v60, %v1898_v39  ;;  %v895_v26 = vmax.f32 %v863_v12, 0.0 }
 0x207   : > { %v1015_v3 = vadd.f32 %v1014_v21, %v1000_v42  ;;  %v1126_v56 = vadd.f32 %v1125_v63, %v1111_v0  ;;  %v858_v58 = vadd.f32 %v857_v25, %v1890_v35  ;;  %v893_v13 = vmax.f32 %v855_v29, 0.0  ;;  %v971_v10 = vpop.permute.xlu1 %970 }
 0x208   : > { %v976_v37 = vpop.permute.xlu0 %975  ;;  %v896_v21 = vmax.f32 %v866_v19, 0.0 }
 0x209   : > { %v1127_v57 = vadd.f32 %v1126_v56, %v1112_v27  ;;  %v1016_v30 = vadd.f32 %v1015_v3, %v1001_v62  ;;  %v894_v35 = vmax.f32 %v858_v58, 0.0  ;;  %v1006_v42 = vmul.f32 %v961_v23, %v893_v13 }
 0x20a   : > { %v1117_v0 = vmul.f32 %v1904_v43, %v893_v13  ;;  %v1119_v62 = vmul.f32 %v1912_v47, %v895_v26  ;;  %v1008_v3 = vmul.f32 %v971_v10, %v895_v26  ;;  %v1120_v28 = vmul.f32 %v1916_v49, %v896_v21 }
 0x20b   : > { %v1385_v6 = vpop.f32.mrb[8].mxu1  ;;  %v1128_v1 = vadd.f32 %v1127_v57, %v1113_v4  ;;  %v1017_v9 = vadd.f32 %v1016_v30, %v1002_v61  ;;  %v1007_v63 = vmul.f32 %v966_v8, %v894_v35  ;;  %v1118_v60 = vmul.f32 %v1908_v45, %v894_v35  ;;  %v981_v22 = vpop.permute.xlu1 %980 }
 0x20c   : > { %v870_v11 = vpop.f32.mrb[9].mxu1  ;;  %v879_v2 = vadd.f32 %v1385_v6, %v1910_v46  ;;  %v1009_v61 = vmul.f32 %v976_v37, %v896_v21 }
 0x20d   : > { %v1386_v33 = vpop.f32.mrb[10].mxu1  ;;  %v1129_v34 = vadd.f32 %v1128_v1, %v1114_v32  ;;  %v1018_v17 = vadd.f32 %v1017_v9, %v1003_v31  ;;  %v871_v15 = vadd.f32 %v870_v11, %v1902_v41  ;;  %v986_v41 = vpop.permute.xlu0 %985 }
 0x20e   : > { %v873_v18 = vpop.f32.mrb[11].mxu1  ;;  %v882_v54 = vadd.f32 %v1386_v33, %v1914_v48  ;;  %v899_v4 = vmax.f32 %v879_v2, 0.0 }
 0x20f   : > { %v1130_v36 = vadd.f32 %v1129_v34, %v1115_v59  ;;  %v1019_v20 = vadd.f32 %v1018_v17, %v1004_v14  ;;  %v874_v40 = vadd.f32 %v873_v18, %v1906_v44  ;;  %v897_v43 = vmax.f32 %v871_v15, 0.0  ;;  %v991_v5 = vpop.permute.xlu1 %990 }
 0x210   : > { %v900_v46 = vmax.f32 %v882_v54, 0.0  ;;  %v1123_v48 = vmul.f32 %v1918_v50, %v899_v4  ;;  %v1012_v1 = vmul.f32 %v991_v5, %v899_v4 }
 0x211   : > { %v1020_v16 = vadd.f32 %v1019_v20, %v1005_v24  ;;  %v1131_v38 = vadd.f32 %v1130_v36, %v1116_v7  ;;  %v898_v45 = vmax.f32 %v874_v40, 0.0  ;;  %v1010_v57 = vmul.f32 %v981_v22, %v897_v43  ;;  %v996_v31 = vpop.permute.xlu0 %995 }
 0x212   : > { %v1121_v47 = vmul.f32 %v1920_v51, %v897_v43  ;;  %v1124_v11 = vmul.f32 %v1926_v55, %v900_v46  ;;  %v1013_v33 = vmul.f32 %v996_v31, %v900_v46  ;;  %v1040_v51 = vlaneseq }
 0x213   : > { %v1021_v25 = vadd.f32 %v1020_v16, %v1006_v42  ;;  %v1132_v39 = vadd.f32 %v1131_v38, %v1117_v0  ;;  %v1011_v6 = vmul.f32 %v986_v41, %v898_v45  ;;  %v1122_v49 = vmul.f32 %v1924_v53, %v898_v45  ;;  %v1038_v50 = vpop.permute.xlu1 %1037 }
 0x214   : > { %v1041_v18 = vshrl.u32 %v1040_v51, 7 }
 0x215   : > { %v1133_v27 = vadd.f32 %v1132_v39, %v1118_v60  ;;  %v1022_v56 = vadd.f32 %v1021_v25, %v1007_v63 }
 0x216   : > { %v1042_v7 = vsub.s32 0, %v1041_v18 }
 0x217   : > { %v1134_v23 = vadd.f32 %v1133_v27, %v1119_v62  ;;  %v1023_v29 = vadd.f32 %v1022_v56, %v1008_v3 }
 0x218   : > { %v1043_v26 = vrot.slane %v1038_v50, %v1042_v7  ;;  %v1153_v42 = vrot.slane %v1922_v52, %v1042_v7 }
 0x219   : > { %v1024_v44 = vadd.f32 %v1023_v29, %v1009_v61  ;;  %v1135_v30 = vadd.f32 %v1134_v23, %v1120_v28 }
 0x21b   : > { %v1025_v8 = vadd.f32 %v1024_v44, %v1010_v57  ;;  %v1136_v58 = vadd.f32 %v1135_v30, %v1121_v47 }
 0x21d   : > { %v1137_v32 = vadd.f32 %v1136_v58, %v1122_v49  ;;  %v1026_v9 = vadd.f32 %v1025_v8, %v1011_v6 }
 0x21f   : > { %v1138_v12 = vadd.f32 %v1137_v32, %v1123_v48  ;;  %v1027_v13 = vadd.f32 %v1026_v9, %v1012_v1 }
 0x221   : > { %v1139_v59 = vadd.f32 %v1138_v12, %v1124_v11  ;;  %v1028_v34 = vadd.f32 %v1027_v13, %v1013_v33 }
 0x223   : > { %v1140_v14 = vrot.slane %v1139_v59, 4  ;;  %v1029_v17 = vrot.slane %v1028_v34, 4 }
 0x225   : > { %v1141_v19 = vadd.f32 %v1140_v14, %v1139_v59  ;;  %v1030_v53 = vadd.f32 %v1029_v17, %v1028_v34 }
 0x227   : > { %v1142_v35 = vrot.slane %v1141_v19, 2  ;;  %v1031_v10 = vrot.slane %v1030_v53, 2 }
 0x229   : > { %v1143_v36 = vadd.f32 %v1142_v35, %v1141_v19  ;;  %v1032_v20 = vadd.f32 %v1031_v10, %v1030_v53 }
 0x22b   : > { %v1144_v24 = vrot.slane %v1143_v36, 1  ;;  %v1033_v55 = vrot.slane %v1032_v20, 1 }
 0x22d   : > { %v1145_v37 = vadd.f32 %v1144_v24, %v1143_v36  ;;  %v1034_v16 = vadd.f32 %v1033_v55, %v1032_v20 }
 0x22f   : > { %v1154_v0 = vadd.f32 %v1153_v42, %v1145_v37  ;;  %v1044_v38 = vadd.f32 %v1043_v26, %v1034_v16 }
 0x231   : > { %v1155_v15 = vsub.f32 -1.609438, %v1154_v0  ;;  %1191 = vst [vmem:[%s1952_s29] sm:$0x1] %v1044_v38 }
 0x233   : > { %v1157_v21 = vand.u32 2147483647, %v1155_v15  ;;  %v1156_v3 = vmax.f32 %v1155_v15, 0.0 }
 0x235   : > { %v1158_v63 = vsub.f32 0.0, %v1157_v21 }
 0x237   : > { %v1159_v25 = vmul.f32 1.442695, %v1158_v63 }
 0x239   : > { %1469 = vpow2.f32 %v1159_v25 }
 0x243   : > { %v1470_v39 = vpop.eup %1469 }
 0x244   : > { %v1161_v60 = vadd.f32 1.0, %v1470_v39  ;;  %v1164_v40 = vmul.f32 -0.5, %v1470_v39  ;;  %v1167_v22 = vand.u32 2147483647, %v1470_v39 }
 0x246   : > { %1471 = vlog2.f32 %v1161_v60  ;;  %v1165_v62 = vadd.f32 1.0, %v1164_v40  ;;  %vm1168_vm1 = vcmp.lt.f32.partialorder %v1167_v22, 0.0004427343 }
 0x248   : > { %v1166_v27 = vmul.f32 %v1470_v39, %v1165_v62 }
 0x250   : > { %v1472_v52 = vpop.eup %1471 }
 0x251   : > { %v1163_v2 = vmul.f32 0.6931472, %v1472_v52 }
 0x253   : > { %v1169_v56 = vsel %vm1168_vm1, %v1166_v27, %v1163_v2 }
 0x254   : > { %v1170_v43 = vadd.f32 %v1169_v56, %v1156_v3 }
 0x256   : > { %v1171_v28 = vsub.f32 -1.609438, %v1170_v43 }
 0x258   : > { %v1304_v41 = vadd.f32 2.3025851, %v1171_v28 }
 0x25a   : > { %v1174_v54 = vand.u32 2147483647, %v1304_v41  ;;  %v1173_v5 = vmax.f32 %v1304_v41, 0.0 }
 0x25c   : > { %v1175_v23 = vsub.f32 0.0, %v1174_v54 }
 0x25e   : > { %v1176_v29 = vmul.f32 1.442695, %v1175_v23 }
 0x260   : > { %1473 = vpow2.f32 %v1176_v29 }
 0x26a   : > { %v1474_v61 = vpop.eup %1473 }
 0x26b   : > { %v1178_v45 = vadd.f32 1.0, %v1474_v61  ;;  %v1181_v4 = vmul.f32 -0.5, %v1474_v61  ;;  %v1184_v57 = vand.u32 2147483647, %v1474_v61 }
 0x26d   : > { %1475 = vlog2.f32 %v1178_v45  ;;  %v1182_v44 = vadd.f32 1.0, %v1181_v4  ;;  %vm1185_vm2 = vcmp.lt.f32.partialorder %v1184_v57, 0.0004427343 }
 0x26f   : > { %v1183_v46 = vmul.f32 %v1474_v61, %v1182_v44 }
 0x277   : > { %v1476_v47 = vpop.eup %1475 }
 0x278   : > { %v1180_v30 = vmul.f32 0.6931472, %v1476_v47 }
 0x27a   : > { %v1186_v8 = vsel %vm1185_vm2, %v1183_v46, %v1180_v30 }
 0x27b   : > { %v1187_v58 = vadd.f32 %v1186_v8, %v1173_v5 }
 0x27d   : > { %v1188_v6 = vadd.f32 -2.3025851, %v1187_v58 }
 0x27f   : > { %v1189_v49 = vmul.f32 1.442695, %v1188_v6 }
 0x281   : > { %1477 = vpow2.f32 %v1189_v49 }
 0x28b   : > { %v1478_v31 = vpop.eup %1477 }
 0x28c   : > { %1192 = vst [vmem:[%s1952_s29 + $0x1] sm:$0x1] %v1478_v31 }
 0x28d   : > { %1492 = shalt.err (!%p1489_p5)
}
 0x28e   : > { %s1493_s20 = scalar_lea.hbm %s1961_s15, 32  ;;  %s1497_s23 = scalar_lea.hbm %s2013_s7, 64 }
 0x28f   : > { %p1494_p7 = scmp.ne.s32.totalorder %s1961_s15, %s1493_s20  ;;  %p1498_p12 = scmp.lt.u32.totalorder %s1961_s15, %s2013_s7 }
 0x290   : > { %p1499_p13 = scmp.lt.u32.totalorder %s1497_s23, %s1493_s20  ;;  %p1501_p1 = scmp.lt.u32.totalorder %s1493_s20, %s1961_s15 }
 0x291   : > { %p1495_p10 = pnand %p1494_p7, %p1624_p6 }
 0x292   : > { %p1500_p0 = por %p1499_p13, %p1498_p12 }
 0x293   : > { %p1496_p11 = pneg %p1495_p10 }
 0x294   : > { %p1502_p2 = por %p1501_p1, %p1500_p0 }
 0x296   : > { %p1503_p3 = pnand %p1502_p2, %p1496_p11 }
 0x298   : > { %1506 = shalt.err (!%p1503_p3)
}
 0x299   : > { %1403 = dma.vmem_to_hbm [thread:$0]  (%p1624_p6), %s1963_s9, 32, %s1961_s15, %s1194_s16  }
 0x29a PF: > { %s1219_s13 = sand.u32 1, %s1529_s24   ;;  %p1406_p4 = pnand %p1274_p9, %p1628_p8 }
 0x29b   : > { %s1220_s14 = scalar_lea.sflag [#allocation4], %s1219_s13 }
 0x29c   : > { %1524 = dma.done.wait (!%p1406_p4), %s1220_s14, 32  }
 0x29d   : > { %1526 = vsyncadd (!%p1406_p4), %s1220_s14, 4294967264  ;;  %p17_p5 = scmp.ge.s32.totalorder %s1609_s30, 4   ;;  %s2016_s24 = smov %s1533_s25 }
 0x29e   : > { %s2017_s25 = smov %s1537_s26  ;;  %s2018_s26 = smov %s1622_s10 }
 0x29f   : > { %s2019_s27 = smov %s1609_s30  ;;  %19 = sbr.rel (!%p17_p5) target bundleno = 3 (0x3), region = 126 }
 0x2a6   :  { %1225 = vsyncpa [#allocation4], 1 }
 0x2a7   :  { %1227 = vsyncpa [#allocation4 + $0x1], 1 }

</bundles_post_ra>
